<compile_context>
chip_gen: v5e
topology: v5e:2x2
jax: 0.10.0
libtpu: 0.0.40
codegen_flags: <defaults>
</compile_context>

<pallas_src>
import functools

import jax
import jax.numpy as jnp
from jax import lax
from jax.experimental import pallas as pl
from jax.experimental.pallas import tpu as pltpu


# ----------------------------------------------------------------------------
# Fused kernel: all B batch elements in one invocation (no grid).
#   qkv_hm = Wqkv_hm @ x_b^T                      (3*H*hs, T), head-major rows
#   per all heads (batched): s = q k ; causal mask ; softmax ; o = s @ v
#   out_b  = sum_h (o_h @ Wproj_h)                (T, C)
# ----------------------------------------------------------------------------
def _mha_fused_kernel(x_ref, wqkv_ref, wprojh_ref, o_ref, *,
                      num_heads, head_size, batch):
    H, hs = num_heads, head_size
    hhs = H * hs
    T = x_ref.shape[1]

    wqkv = wqkv_ref[...]        # (3*H*hs, C)  loaded once, reused for all b
    wprojh = wprojh_ref[...]    # (H, hs, C)

    # Causal mask, computed once and broadcast over the head axis.
    row = lax.broadcasted_iota(jnp.int32, (T, T), 0)
    col = lax.broadcasted_iota(jnp.int32, (T, T), 1)
    causal = col <= row
    neg_big = jnp.float32(-1e30)     # finite: NaN-safe for fully-masked rows

    for b in range(batch):           # static unroll over tiny B; block-aligned ref slabs only
        x_b = x_ref[b]               # (T, C)

        # Head-major fused QKV projection: one MXU pass, contracting C of both
        # operands (A @ B^T form — no transpose materialized, scale pre-folded).
        qkv = lax.dot_general(wqkv, x_b, (((1,), (1,)), ((), ())),
                              preferred_element_type=jnp.float32)   # (3*H*hs, T)
        q_hm = qkv[0 * hhs:1 * hhs].reshape(H, hs, T)   # q[h, d, t]
        k_hm = qkv[1 * hhs:2 * hhs].reshape(H, hs, T)   # k[h, d, t]
        v_hm = qkv[2 * hhs:3 * hhs].reshape(H, hs, T)   # v[h, d, t]
        q = jnp.swapaxes(q_hm, 1, 2)                    # (H, T, hs)

        # Scores for ALL heads in one batched contraction (leading batch dim H).
        s = jnp.einsum('hid,hdj->hij', q, k_hm,
                       preferred_element_type=jnp.float32)          # (H, T, T)
        s = jnp.where(causal, s, neg_big)

        # Numerically-stable softmax over the key axis.
        m = jnp.max(s, axis=-1, keepdims=True)
        p = jnp.exp(s - m)
        denom = jnp.sum(p, axis=-1, keepdims=True)
        # approx reciprocal runs on the EUP slot; one Newton step restores
        # ~f32 accuracy so the tight reference tolerance still passes.
        r = pl.reciprocal(denom, approx=True)
        r = r * (2.0 - denom * r)
        wei = p * r                                                 # (H, T, T)
        # TODO(synk): dropout on `wei` skipped (identity / eval mode).

        # wei @ v for all heads (contraction over the key axis of both operands).
        o_heads = jnp.einsum('hij,hdj->hid', wei, v_hm,
                             preferred_element_type=jnp.float32)    # (H, T, hs)

        # Output projection applied per head, reduced over heads — equivalent
        # to concat(heads) @ Wproj without a lane-axis concat.
        out_b = jnp.einsum('hid,hdc->hic', o_heads, wprojh,
                           preferred_element_type=jnp.float32).sum(axis=0)   # (T, C)

        o_ref[b] = out_b.astype(o_ref.dtype)


# ----------------------------------------------------------------------------
# One-time parameter preprocessing (hoisted out of the forward pass).
# ----------------------------------------------------------------------------
def prepare_mha_params(wq, wk, wv, w_proj):
    """wq/wk/wv: (H, C, hs) per-head weights (x @ w convention); w_proj: (H*hs, C).

    Returns:
      w_qkv_hm:  (3*H*hs, C) head-major fused QKV weight, softmax scale
                 (embedding-dim ** -0.5, matching the PyTorch module) folded
                 into the q rows.
      w_proj_hm: (H, hs, C) per-head output-projection weight.
    """
    H, C, hs = wq.shape
    scale = C ** (-0.5)    # module scales scores by embedding dim, not head dim
    wq_hm = jnp.transpose(wq, (0, 2, 1)).reshape(H * hs, C) * scale
    wk_hm = jnp.transpose(wk, (0, 2, 1)).reshape(H * hs, C)
    wv_hm = jnp.transpose(wv, (0, 2, 1)).reshape(H * hs, C)
    w_qkv_hm = jnp.concatenate([wq_hm, wk_hm, wv_hm], axis=0)       # (3*H*hs, C)
    w_proj_hm = w_proj.reshape(H, hs, C)
    return w_qkv_hm, w_proj_hm


def multi_head_attention(x, w_qkv_hm, w_proj_hm, *, num_heads, head_size):
    """x: (B, T, C); w_qkv_hm: (3*H*hs, C); w_proj_hm: (H, hs, C)."""
    B, T, C = x.shape
    H, hs = num_heads, head_size
    hhs = H * hs

    flops = 2 * B * (3 * hhs * C * T          # fused QKV projection
                     + 2 * H * T * T * hs     # scores + wei @ v (all heads)
                     + H * T * hs * C)        # per-head output projection
    bytes_accessed = 4 * (x.size + w_qkv_hm.size + w_proj_hm.size + B * T * C)

    return pl.pallas_call(
        functools.partial(_mha_fused_kernel,
                          num_heads=H, head_size=hs, batch=B),
        out_shape=jax.ShapeDtypeStruct((B, T, C), x.dtype),
        in_specs=[
            pl.BlockSpec(memory_space=pltpu.MemorySpace.VMEM),   # x (B, T, C)
            pl.BlockSpec(memory_space=pltpu.MemorySpace.VMEM),   # fused QKV weight
            pl.BlockSpec(memory_space=pltpu.MemorySpace.VMEM),   # per-head proj weight
        ],
        out_specs=pl.BlockSpec(memory_space=pltpu.MemorySpace.VMEM),
        compiler_params=pltpu.CompilerParams(
            # Everything is VMEM-resident; raised above the v5e 16 MiB scoped
            # default.  Re-derive from real tile sizes once shapes grow.
            vmem_limit_bytes=32 * 1024 * 1024),
        cost_estimate=pl.CostEstimate(
            flops=flops,
            transcendentals=B * H * T * T,    # exp in softmax
            bytes_accessed=bytes_accessed),
    )(x, w_qkv_hm, w_proj_hm)


# ----------------------------------------------------------------------------
# Pure-JAX reference for sanity checking (mirrors the PyTorch module).
# ----------------------------------------------------------------------------
def _reference(x, wq, wk, wv, w_proj):
    B, T, C = x.shape
    H, _, hs = wq.shape
    scale = C ** (-0.5)
    mask = jnp.tril(jnp.ones((T, T), dtype=bool))
    outs = []
    for h in range(H):
        q = x @ wq[h]
        k = x @ wk[h]
        v = x @ wv[h]
        s = (q @ jnp.swapaxes(k, -2, -1)) * scale
        s = jnp.where(mask, s, -jnp.inf)
        wei = jax.nn.softmax(s, axis=-1)
        outs.append(wei @ v)
    concat = jnp.concatenate(outs, axis=-1)
    return concat @ w_proj


if __name__ == "__main__":
    # Small shapes consistent with the module:
    B = 2            # batch
    T = 8            # sequence length (== block_size)
    num_embed = 32   # C
    num_heads = 4
    head_size = 8

    key = jax.random.PRNGKey(0)
    kx, kq, kk, kv, kp = jax.random.split(key, 5)

    x = jax.random.normal(kx, (B, T, num_embed), dtype=jnp.float32)
    # Deterministic parameter init (nn.Linear equivalent, stored pre-transposed
    # as [C, head_size] per head).
    init_scale = num_embed ** (-0.5)
    wq = jax.random.normal(kq, (num_heads, num_embed, head_size), jnp.float32) * init_scale
    wk = jax.random.normal(kk, (num_heads, num_embed, head_size), jnp.float32) * init_scale
    wv = jax.random.normal(kv, (num_heads, num_embed, head_size), jnp.float32) * init_scale
    w_proj = jax.random.normal(kp, (num_heads * head_size, num_embed), jnp.float32) \
        * ((num_heads * head_size) ** (-0.5))

    # One-time parameter prep (would be cached at load time in a real model).
    w_qkv_hm, w_proj_hm = prepare_mha_params(wq, wk, wv, w_proj)

    out = multi_head_attention(x, w_qkv_hm, w_proj_hm,
                               num_heads=num_heads, head_size=head_size)
    out = jax.block_until_ready(out)

    ref = _reference(x, wq, wk, wv, w_proj)
    assert out.shape == (B, T, num_embed)
    # 2e-4: f32 accumulate everywhere; approx EUP reciprocal is refined with one
    # Newton step (residual relative error ~1e-6).
    assert jnp.allclose(out, ref, atol=2e-4, rtol=2e-4), "mismatch vs reference"

    print("KERNEL_OK")
</pallas_src>

<mosaic_0001>
module attributes {stable_mosaic.version = 11 : i64} {
  func.func @_mha_fused_kernel(%arg0: memref<2x8x32xf32, #tpu.memory_space<vmem>>, %arg1: memref<96x32xf32, #tpu.memory_space<vmem>>, %arg2: memref<4x8x32xf32, #tpu.memory_space<vmem>>, %arg3: memref<2x8x32xf32, #tpu.memory_space<vmem>>) attributes {dimension_semantics = [], scalar_prefetch = 0 : i64, scratch_operands = 0 : i64, tpu.core_type = #tpu.core_type<tc>} {
    %c0 = arith.constant 0 : index
    %c0_0 = arith.constant 0 : index
    %0 = vector.load %arg1[%c0, %c0_0] : memref<96x32xf32, #tpu.memory_space<vmem>>, vector<96x32xf32>
    %c0_1 = arith.constant 0 : index
    %c0_2 = arith.constant 0 : index
    %c0_3 = arith.constant 0 : index
    %1 = vector.load %arg2[%c0_1, %c0_2, %c0_3] : memref<4x8x32xf32, #tpu.memory_space<vmem>>, vector<4x8x32xf32>
    %2 = tpu.iota {dimensions = array<i32: 0>} : vector<8x8xi32>
    %3 = tpu.iota {dimensions = array<i32: 1>} : vector<8x8xi32>
    %4 = arith.cmpi sle, %3, %2 : vector<8x8xi32>
    %c0_4 = arith.constant 0 : index
    %c0_5 = arith.constant 0 : index
    %c0_6 = arith.constant 0 : index
    %5 = vector.load %arg0[%c0_4, %c0_5, %c0_6] : memref<2x8x32xf32, #tpu.memory_space<vmem>>, vector<1x8x32xf32>
    %6 = vector.shape_cast %5 : vector<1x8x32xf32> to vector<8x32xf32>
    %cst = arith.constant dense<0.000000e+00> : vector<96x8xf32>
    %7 = tpu.matmul %0, %6, %cst {dimension_numbers = #tpu.dot_dimension_numbers<[1], [1], [0], [0], [0, 0, 1, 0], [], []>} : vector<96x32xf32>, vector<8x32xf32>, vector<96x8xf32> -> vector<96x8xf32>
    %8 = vector.extract_strided_slice %7 {offsets = [0, 0], sizes = [32, 8], strides = [1, 1]} : vector<96x8xf32> to vector<32x8xf32>
    %9 = vector.shape_cast %8 : vector<32x8xf32> to vector<4x8x8xf32>
    %10 = vector.extract_strided_slice %7 {offsets = [32, 0], sizes = [32, 8], strides = [1, 1]} : vector<96x8xf32> to vector<32x8xf32>
    %11 = vector.shape_cast %10 : vector<32x8xf32> to vector<4x8x8xf32>
    %12 = vector.extract_strided_slice %7 {offsets = [64, 0], sizes = [32, 8], strides = [1, 1]} : vector<96x8xf32> to vector<32x8xf32>
    %13 = vector.shape_cast %12 : vector<32x8xf32> to vector<4x8x8xf32>
    %14 = tpu.transpose %9, [0, 2, 1] : vector<4x8x8xf32> -> vector<4x8x8xf32>
    "tpu.trace_start"() <{level = 10 : i32, message = "hid,hdj->hij"}> : () -> ()
    %cst_7 = arith.constant dense<0.000000e+00> : vector<4x8x8xf32>
    %15 = tpu.matmul %14, %11, %cst_7 {dimension_numbers = #tpu.dot_dimension_numbers<[2], [1], [1], [2], [0, 0, 0, 1, 1, 2], [0], [0]>} : vector<4x8x8xf32>, vector<4x8x8xf32>, vector<4x8x8xf32> -> vector<4x8x8xf32>
    %cst_8 = arith.constant -1.000000e+30 : f32
    "tpu.trace_stop"() : () -> ()
    %16 = vector.shape_cast %4 : vector<8x8xi1> to vector<1x8x8xi1>
    %17 = vector.broadcast %16 : vector<1x8x8xi1> to vector<4x8x8xi1>
    %18 = vector.broadcast %cst_8 : f32 to vector<4x8x8xf32>
    %19 = arith.select %17, %15, %18 : vector<4x8x8xi1>, vector<4x8x8xf32>
    %cst_9 = arith.constant dense<0xFF800000> : vector<4x8xf32>
    %20 = vector.multi_reduction <maximumf>, %19, %cst_9 [2] : vector<4x8x8xf32> to vector<4x8xf32>
    %21 = vector.shape_cast %20 : vector<4x8xf32> to vector<4x8x1xf32>
    %22 = vector.broadcast %21 : vector<4x8x1xf32> to vector<4x8x8xf32>
    %23 = arith.subf %19, %22 : vector<4x8x8xf32>
    %24 = math.exp %23 : vector<4x8x8xf32>
    %cst_10 = arith.constant dense<0.000000e+00> : vector<4x8xf32>
    %25 = vector.multi_reduction <add>, %24, %cst_10 [2] : vector<4x8x8xf32> to vector<4x8xf32>
    %26 = vector.shape_cast %25 : vector<4x8xf32> to vector<4x8x1xf32>
    %27 = tpu.reciprocal %26 {approx = true} : vector<4x8x1xf32> -> vector<4x8x1xf32>
    %28 = arith.mulf %26, %27 : vector<4x8x1xf32>
    %cst_11 = arith.constant 2.000000e+00 : f32
    %29 = vector.broadcast %cst_11 : f32 to vector<4x8x1xf32>
    %30 = arith.subf %29, %28 : vector<4x8x1xf32>
    %31 = arith.mulf %27, %30 : vector<4x8x1xf32>
    %32 = vector.broadcast %31 : vector<4x8x1xf32> to vector<4x8x8xf32>
    %33 = arith.mulf %24, %32 : vector<4x8x8xf32>
    "tpu.trace_start"() <{level = 10 : i32, message = "hij,hdj->hid"}> : () -> ()
    %cst_12 = arith.constant dense<0.000000e+00> : vector<4x8x8xf32>
    %34 = tpu.matmul %33, %13, %cst_12 {dimension_numbers = #tpu.dot_dimension_numbers<[2], [2], [1], [1], [0, 0, 0, 1, 1, 1], [0], [0]>} : vector<4x8x8xf32>, vector<4x8x8xf32>, vector<4x8x8xf32> -> vector<4x8x8xf32>
    "tpu.trace_stop"() : () -> ()
    "tpu.trace_start"() <{level = 10 : i32, message = "hid,hdc->hic"}> : () -> ()
    %cst_13 = arith.constant dense<0.000000e+00> : vector<4x8x32xf32>
    %35 = tpu.matmul %34, %1, %cst_13 {dimension_numbers = #tpu.dot_dimension_numbers<[2], [1], [1], [2], [0, 0, 0, 1, 1, 2], [0], [0]>} : vector<4x8x8xf32>, vector<4x8x32xf32>, vector<4x8x32xf32> -> vector<4x8x32xf32>
    "tpu.trace_stop"() : () -> ()
    %cst_14 = arith.constant dense<0.000000e+00> : vector<8x32xf32>
    %36 = vector.multi_reduction <add>, %35, %cst_14 [0] : vector<4x8x32xf32> to vector<8x32xf32>
    %c0_15 = arith.constant 0 : index
    %c0_16 = arith.constant 0 : index
    %c0_17 = arith.constant 0 : index
    %37 = vector.load %arg3[%c0_15, %c0_16, %c0_17] : memref<2x8x32xf32, #tpu.memory_space<vmem>>, vector<1x8x32xf32>
    %38 = vector.shape_cast %37 : vector<1x8x32xf32> to vector<8x32xf32>
    %39 = vector.shape_cast %36 : vector<8x32xf32> to vector<1x8x32xf32>
    tpu.vector_store %arg3[%c0_15, %c0_16, %c0_17], %39 {strides = array<i32>} : memref<2x8x32xf32, #tpu.memory_space<vmem>>, vector<1x8x32xf32>,
    %c1 = arith.constant 1 : index
    %c0_18 = arith.constant 0 : index
    %c0_19 = arith.constant 0 : index
    %40 = vector.load %arg0[%c1, %c0_18, %c0_19] : memref<2x8x32xf32, #tpu.memory_space<vmem>>, vector<1x8x32xf32>
    %41 = vector.shape_cast %40 : vector<1x8x32xf32> to vector<8x32xf32>
    %cst_20 = arith.constant dense<0.000000e+00> : vector<96x8xf32>
    %42 = tpu.matmul %0, %41, %cst_20 {dimension_numbers = #tpu.dot_dimension_numbers<[1], [1], [0], [0], [0, 0, 1, 0], [], []>} : vector<96x32xf32>, vector<8x32xf32>, vector<96x8xf32> -> vector<96x8xf32>
    %43 = vector.extract_strided_slice %42 {offsets = [0, 0], sizes = [32, 8], strides = [1, 1]} : vector<96x8xf32> to vector<32x8xf32>
    %44 = vector.shape_cast %43 : vector<32x8xf32> to vector<4x8x8xf32>
    %45 = vector.extract_strided_slice %42 {offsets = [32, 0], sizes = [32, 8], strides = [1, 1]} : vector<96x8xf32> to vector<32x8xf32>
    %46 = vector.shape_cast %45 : vector<32x8xf32> to vector<4x8x8xf32>
    %47 = vector.extract_strided_slice %42 {offsets = [64, 0], sizes = [32, 8], strides = [1, 1]} : vector<96x8xf32> to vector<32x8xf32>
    %48 = vector.shape_cast %47 : vector<32x8xf32> to vector<4x8x8xf32>
    %49 = tpu.transpose %44, [0, 2, 1] : vector<4x8x8xf32> -> vector<4x8x8xf32>
    "tpu.trace_start"() <{level = 10 : i32, message = "hid,hdj->hij"}> : () -> ()
    %cst_21 = arith.constant dense<0.000000e+00> : vector<4x8x8xf32>
    %50 = tpu.matmul %49, %46, %cst_21 {dimension_numbers = #tpu.dot_dimension_numbers<[2], [1], [1], [2], [0, 0, 0, 1, 1, 2], [0], [0]>} : vector<4x8x8xf32>, vector<4x8x8xf32>, vector<4x8x8xf32> -> vector<4x8x8xf32>
    %cst_22 = arith.constant -1.000000e+30 : f32
    "tpu.trace_stop"() : () -> ()
    %51 = vector.shape_cast %4 : vector<8x8xi1> to vector<1x8x8xi1>
    %52 = vector.broadcast %51 : vector<1x8x8xi1> to vector<4x8x8xi1>
    %53 = vector.broadcast %cst_22 : f32 to vector<4x8x8xf32>
    %54 = arith.select %52, %50, %53 : vector<4x8x8xi1>, vector<4x8x8xf32>
    %cst_23 = arith.constant dense<0xFF800000> : vector<4x8xf32>
    %55 = vector.multi_reduction <maximumf>, %54, %cst_23 [2] : vector<4x8x8xf32> to vector<4x8xf32>
    %56 = vector.shape_cast %55 : vector<4x8xf32> to vector<4x8x1xf32>
    %57 = vector.broadcast %56 : vector<4x8x1xf32> to vector<4x8x8xf32>
    %58 = arith.subf %54, %57 : vector<4x8x8xf32>
    %59 = math.exp %58 : vector<4x8x8xf32>
    %cst_24 = arith.constant dense<0.000000e+00> : vector<4x8xf32>
    %60 = vector.multi_reduction <add>, %59, %cst_24 [2] : vector<4x8x8xf32> to vector<4x8xf32>
    %61 = vector.shape_cast %60 : vector<4x8xf32> to vector<4x8x1xf32>
    %62 = tpu.reciprocal %61 {approx = true} : vector<4x8x1xf32> -> vector<4x8x1xf32>
    %63 = arith.mulf %61, %62 : vector<4x8x1xf32>
    %cst_25 = arith.constant 2.000000e+00 : f32
    %64 = vector.broadcast %cst_25 : f32 to vector<4x8x1xf32>
    %65 = arith.subf %64, %63 : vector<4x8x1xf32>
    %66 = arith.mulf %62, %65 : vector<4x8x1xf32>
    %67 = vector.broadcast %66 : vector<4x8x1xf32> to vector<4x8x8xf32>
    %68 = arith.mulf %59, %67 : vector<4x8x8xf32>
    "tpu.trace_start"() <{level = 10 : i32, message = "hij,hdj->hid"}> : () -> ()
    %cst_26 = arith.constant dense<0.000000e+00> : vector<4x8x8xf32>
    %69 = tpu.matmul %68, %48, %cst_26 {dimension_numbers = #tpu.dot_dimension_numbers<[2], [2], [1], [1], [0, 0, 0, 1, 1, 1], [0], [0]>} : vector<4x8x8xf32>, vector<4x8x8xf32>, vector<4x8x8xf32> -> vector<4x8x8xf32>
    "tpu.trace_stop"() : () -> ()
    "tpu.trace_start"() <{level = 10 : i32, message = "hid,hdc->hic"}> : () -> ()
    %cst_27 = arith.constant dense<0.000000e+00> : vector<4x8x32xf32>
    %70 = tpu.matmul %69, %1, %cst_27 {dimension_numbers = #tpu.dot_dimension_numbers<[2], [1], [1], [2], [0, 0, 0, 1, 1, 2], [0], [0]>} : vector<4x8x8xf32>, vector<4x8x32xf32>, vector<4x8x32xf32> -> vector<4x8x32xf32>
    "tpu.trace_stop"() : () -> ()
    %cst_28 = arith.constant dense<0.000000e+00> : vector<8x32xf32>
    %71 = vector.multi_reduction <add>, %70, %cst_28 [0] : vector<4x8x32xf32> to vector<8x32xf32>
    %c1_29 = arith.constant 1 : index
    %c0_30 = arith.constant 0 : index
    %c0_31 = arith.constant 0 : index
    %72 = vector.load %arg3[%c1_29, %c0_30, %c0_31] : memref<2x8x32xf32, #tpu.memory_space<vmem>>, vector<1x8x32xf32>
    %73 = vector.shape_cast %72 : vector<1x8x32xf32> to vector<8x32xf32>
    %74 = vector.shape_cast %71 : vector<8x32xf32> to vector<1x8x32xf32>
    tpu.vector_store %arg3[%c1_29, %c0_30, %c0_31], %74 {strides = array<i32>} : memref<2x8x32xf32, #tpu.memory_space<vmem>>, vector<1x8x32xf32>,
    return
  }
}

</mosaic_0001>

<bundles_post_ra>
// kernel: tpu_custom_call.1
= control target key start
LH: loop header
LB: loop body
LE: loop exit
PB: predicated region body
PF: predicated region fallthrough
CT: control target
= control target key end

     0   :  { %vm37_vm0 = vcmask 261120   ;;  %s1559_s0 = inlined_call_operand.vmem [shape: f32[2,8,32], index: 0, kind: input, shape index: {}]   ;;  %s1560_s1 = inlined_call_operand.vmem [shape: f32[96,32], index: 1, kind: input, shape index: {}]   ;;  %s1561_s2 = inlined_call_operand.vmem [shape: f32[4,8,32], index: 2, kind: input, shape index: {}]   ;;  %s1562_s3 = inlined_call_operand.hbm [shape: f32[2,8,32], index: 3, kind: output, shape index: {}]  }
   0x1   :  { %v36_v0 = vld [vmem:[%s1559_s0] sm:$0xff] }
   0x2   :  { %1178 = vmatpush.xpose.msk.msra.mxu0 %vm37_vm0, %v36_v0  ;;  %v1331_v1 = vld [vmem:[%s1560_s1] sm:$0xff] }
   0x3   :  { %8 = vsyncpa [#allocation3], 0  ;;  %v1338_v2 = vld [vmem:[%s1560_s1 + $0x8] sm:$0xff]  ;;  %v1345_v3 = vld [vmem:[%s1560_s1 + $0x10] sm:$0xff]  ;;  %vm258_vm1 = vcmask 64512   ;;  %v31_v17 = vlaneseq  ;;  %s1166_s22 = sshll.u32 %s1562_s3, 4  ;;  %s1167_s22 = int_to_ptr.hbm [resolvable:$true] %s1166_s22 }
   0x4   :  { %v1352_v4 = vld [vmem:[%s1560_s1 + $0x18] sm:$0xff]  ;;  %v1359_v5 = vld [vmem:[%s1560_s1 + $0x20] sm:$0xff]  ;;  %v1366_v6 = vld [vmem:[%s1560_s1 + $0x28] sm:$0xff]  ;;  %s1302_s23 = smov 128   ;;  %s1303_s24 = smov 8  }
   0x5   :  { %1179 = vmatmul.msk.f32.vlgmr.msra.gmra.mxu0 %vm37_vm0, %v1331_v1  ;;  %v1373_v8 = vld [vmem:[%s1560_s1 + $0x30] sm:$0xff]  ;;  %v32_v18 = vshrl.u32 %v31_v17, 7  ;;  %v34_v19 = vand.u32 127, %v31_v17  ;;  %v1392_v27 = vld [vmem:[%s1560_s1 + $0x38] sm:$0xff]  ;;  %v1399_v28 = vld [vmem:[%s1560_s1 + $0x40] sm:$0xff] }
   0x6   :  { %v1406_v29 = vld [vmem:[%s1560_s1 + $0x48] sm:$0xff]  ;;  %v1413_v30 = vld [vmem:[%s1560_s1 + $0x50] sm:$0xff] }
   0x7   :  { %vm1379_vm2 = vcmp.le.s32.totalorder %v34_v19, %v32_v18  ;;  %v1434_v0 = vld [vmem:[%s1561_s2 + $0x8] sm:$0xff] }
   0xd   :  { %1180 = vmatmul.msk.f32.gmra.mxu0 %vm37_vm0, %v1338_v2 }
  0x15   :  { %1181 = vmatmul.msk.f32.gmra.mxu0 %vm37_vm0, %v1345_v3 }
  0x1d   :  { %1182 = vmatmul.msk.f32.gmra.mxu0 %vm37_vm0, %v1352_v4 }
  0x25   :  { %1183 = vmatmul.msk.f32.gmra.mxu0 %vm37_vm0, %v1359_v5 }
  0x2d   :  { %1184 = vmatmul.msk.f32.gmra.mxu0 %vm37_vm0, %v1366_v6 }
  0x35   :  { %1185 = vmatmul.msk.f32.gmra.mxu0 %vm37_vm0, %v1373_v8 }
  0x3d   :  { %1186 = vmatmul.msk.f32.gmra.mxu0 %vm37_vm0, %v1392_v27 }
  0x45   :  { %1187 = vmatmul.msk.f32.gmra.mxu0 %vm37_vm0, %v1399_v28 }
  0x4d   :  { %1188 = vmatmul.msk.f32.gmra.mxu0 %vm37_vm0, %v1406_v29 }
  0x55   :  { %1189 = vmatmul.msk.f32.gmra.mxu0 %vm37_vm0, %v1413_v30 }
  0x82   :  { %v94_v7 = vpop.f32.mrf.mxu0 }
  0x8a   :  { %v97_v9 = vpop.f32.mrf.mxu0 }
  0x8b   :  { %162 = vxpose.xlu0.b32.start.end [1/1] (short) (narrow) %v97_v9, 8  ;;  %v1441_v9 = vld [vmem:[%s1559_s0 + $0x8] sm:$0xff] }
  0x92   :  { %v100_v10 = vpop.f32.mrf.mxu0 }
  0x93   :  { %194 = vxpose.xlu0.b32.start.end [1/1] (short) (narrow) %v100_v10, 8 }
  0x9a   :  { %v103_v11 = vpop.f32.mrf.mxu0 }
  0x9b   :  { %226 = vxpose.xlu2.b32.start.end [1/1] (short) (narrow) %v103_v11, 8  ;;  %v1461_v11 = vld [vmem:[%s1560_s1 + $0x58] sm:$0xff] }
  0x9c   :  { %1190 = vmatmul.msk.f32.gmra.mxu0 %vm37_vm0, %v1461_v11 }
  0xa2   :  { %v106_v12 = vpop.f32.mrf.mxu0 }
  0xa3   :  { %277 = vmatpush.msra.mxu1 %v106_v12 }
  0xaa   :  { %v109_v13 = vpop.f32.mrf.mxu0 }
  0xab   :  { %300 = vmatpush.msra.mxu2 %v109_v13 }
  0xb2   :  { %v112_v14 = vpop.f32.mrf.mxu0 }
  0xb3   :  { %323 = vmatpush.msra.mxu3 %v112_v14 }
  0xba   :  { %v115_v41 = vpop.f32.mrf.mxu0 }
  0xbb   :  { %346 = vmatpush.msrb.mxu1 %v115_v41 }
  0xc2   :  { %v118_v42 = vpop.f32.mrf.mxu0 }
  0xc3   :  { %1195 = vmatpush.xpose.msk.msrb.mxu2 %vm258_vm1, %v118_v42  ;;  %v1492_v42 = vld [vmem:[%s1561_s2] sm:$0xff] }
  0xca   :  { %v121_v44 = vpop.f32.mrf.mxu0 }
  0xcb   :  { %1197 = vmatpush.xpose.msk.msrb.mxu3 %vm258_vm1, %v121_v44 }
  0xd2   :  { %v124_v46 = vpop.f32.mrf.mxu0 }
 0x12f   :  { %v178_v15 = vpop.trf.xlu0 }
 0x130   :  { %1192 = vmatmul.msk.f32.vlgmr.msra.gmra.mxu2 %vm258_vm1, %v178_v15 }
 0x134   :  { %v242_v45 = vpop.trf.xlu2 }
 0x137   :  { %v210_v16 = vpop.trf.xlu0 }
 0x138   :  { %1193 = vmatmul.msk.f32.vlgmr.msra.gmra.mxu3 %vm258_vm1, %v210_v16 }
 0x139   :  { %535 = vmatpush.msra.mxu3 %v1492_v42 }
 0x1b3   :  { %v302_v21 = vpop.f32.mrf.mxu2 }
 0x1b4   :  { %v354_v22 = vsel %vm1379_vm2, %v302_v21, -1e+30  ;;  %v127_v21 = vpop.f32.mrf.mxu0 }
 0x1b5   :  { %v360_v23 = vsel %vm258_vm1, %v354_v22, -inf  ;;  %1201 = vmatpush.xpose.msk.msra.mxu2 %vm258_vm1, %v127_v21 }
 0x1b6   :  { %361 = vmax.xlane.f32.xlu1 %v360_v23 }
 0x1bb   :  { %v325_v24 = vpop.f32.mrf.mxu3 }
 0x1bc   :  { %v355_v25 = vsel %vm1379_vm2, %v325_v24, -1e+30 }
 0x1bd   :  { %v363_v26 = vsel %vm258_vm1, %v355_v25, -inf }
 0x1be   :  { %364 = vmax.xlane.f32.xlu0 %v363_v26 }
 0x1f0   :  { %130 = vxpose.xlu1.b32.start.end [1/1] (short) (narrow) %v94_v7, 8 }
 0x229   :  { %v362_v31 = vpop.xlane.xlu1 %361 }
 0x22a   :  { %v370_v32 = vsub.f32 %v354_v22, %v362_v31 }
 0x22c   :  { %v375_v33 = vmul.f32 1.442695, %v370_v32 }
 0x22e   :  { %1243 = vpow2.f32 %v375_v33  ;;  %v1477_v33 = vld [vmem:[%s1561_s2 + $0x10] sm:$0xff] }
 0x231   :  { %v365_v34 = vpop.xlane.xlu0 %364 }
 0x232   :  { %v371_v35 = vsub.f32 %v355_v25, %v365_v34 }
 0x234   :  { %v1244_v36 = vpop.eup %1243  ;;  %v377_v37 = vmul.f32 1.442695, %v371_v35 }
 0x235   :  { %v384_v38 = vsel %vm258_vm1, %v1244_v36, 0.0 }
 0x236   :  { %1245 = vpow2.f32 %v377_v37  ;;  %385 = vadd.xlane.f32.xlu2 %v384_v38 }
 0x23c   :  { %v1246_v39 = vpop.eup %1245 }
 0x23d   :  { %v387_v40 = vsel %vm258_vm1, %v1246_v39, 0.0 }
 0x23e   :  { %388 = vadd.xlane.f32.xlu0 %v387_v40 }
 0x294   :  { %v146_v43 = vpop.trf.xlu1 }
 0x295   :  { %1191 = vmatmul.msk.f32.vlgmr.msra.gmra.mxu1 %vm258_vm1, %v146_v43 }
 0x296   :  { %1199 = vmatpush.xpose.msk.msra.mxu1 %vm258_vm1, %v124_v46 }
 0x29d   :  { %1194 = vmatmul.msk.f32.vlgmr.msrb.gmra.mxu1 %vm258_vm1, %v242_v45 }
 0x29e   :  { %558 = vmatpush.msrb.mxu1 %v1434_v0 }
 0x2a9   :  { %v386_v47 = vpop.xlane.xlu2 %385 }
 0x2aa   :  { %1247 = vrcp.f32 %v386_v47 }
 0x2b0   :  { %v1248_v48 = vpop.eup %1247 }
 0x2b1   :  { %v398_v49 = vmul.f32 %v1248_v48, %v386_v47  ;;  %v389_v50 = vpop.xlane.xlu0 %388 }
 0x2b2   :  { %1249 = vrcp.f32 %v389_v50 }
 0x2b3   :  { %v402_v51 = vsub.f32 2.0, %v398_v49 }
 0x2b5   :  { %v406_v52 = vmul.f32 %v1248_v48, %v402_v51 }
 0x2b7   :  { %v410_v53 = vmul.f32 %v1244_v36, %v406_v52 }
 0x2b8   :  { %v1250_v54 = vpop.eup %1249 }
 0x2b9   :  { %v399_v55 = vmul.f32 %v1250_v54, %v389_v50  ;;  %1198 = vmatmul.msk.f32.vlgmr.msrb.gmra.mxu3 %vm258_vm1, %v410_v53 }
 0x2bb   :  { %v403_v56 = vsub.f32 2.0, %v399_v55 }
 0x2bd   :  { %v407_v57 = vmul.f32 %v1250_v54, %v403_v56 }
 0x2bf   :  { %v411_v58 = vmul.f32 %v1246_v39, %v407_v57 }
 0x2c1   :  { %1200 = vmatmul.msk.f32.vlgmr.msra.gmra.mxu1 %vm258_vm1, %v411_v58 }
 0x2c2   :  { %1208 = vmatpush.xpose.msk.msra.mxu1 %vm37_vm0, %v1441_v9 }
 0x312   :  { %v279_v59 = vpop.f32.mrf.mxu1 }
 0x313   :  { %v353_v60 = vsel %vm1379_vm2, %v279_v59, -1e+30 }
 0x314   :  { %v357_v61 = vsel %vm258_vm1, %v353_v60, -inf }
 0x315   :  { %358 = vmax.xlane.f32.xlu1 %v357_v61 }
 0x31a   :  { %v348_v62 = vpop.f32.mrf.mxu1 }
 0x31b   :  { %v356_v63 = vsel %vm1379_vm2, %v348_v62, -1e+30 }
 0x31c   :  { %v366_v7 = vsel %vm258_vm1, %v356_v63, -inf }
 0x31d   :  { %367 = vmax.xlane.f32.xlu2 %v366_v7 }
 0x33c   :  { %v462_v10 = vpop.f32.mrf.mxu3 }
 0x33d   :  { %1204 = vmatmul.msk.f32.vlgmr.msrb.gmra.mxu1 %vm258_vm1, %v462_v10 }
 0x33e   :  { %v488_v15 = vpop.f32.mrf.mxu1 }
 0x345   :  { %1209 = vmatmul.msk.f32.vlgmr.msra.gmra.mxu1 %vm37_vm0, %v1331_v1 }
 0x34d   :  { %1210 = vmatmul.msk.f32.gmra.mxu1 %vm37_vm0, %v1338_v2 }
 0x355   :  { %1211 = vmatmul.msk.f32.gmra.mxu1 %vm37_vm0, %v1345_v3 }
 0x35d   :  { %1212 = vmatmul.msk.f32.gmra.mxu1 %vm37_vm0, %v1352_v4 }
 0x365   :  { %1213 = vmatmul.msk.f32.gmra.mxu1 %vm37_vm0, %v1359_v5 }
 0x36d   :  { %1214 = vmatmul.msk.f32.gmra.mxu1 %vm37_vm0, %v1366_v6 }
 0x375   :  { %1215 = vmatmul.msk.f32.gmra.mxu1 %vm37_vm0, %v1373_v8 }
 0x37d   :  { %1216 = vmatmul.msk.f32.gmra.mxu1 %vm37_vm0, %v1392_v27 }
 0x388   :  { %v359_v1 = vpop.xlane.xlu1 %358 }
 0x389   :  { %v369_v2 = vsub.f32 %v353_v60, %v359_v1 }
 0x38b   :  { %v373_v3 = vmul.f32 1.442695, %v369_v2 }
 0x38d   :  { %1251 = vpow2.f32 %v373_v3 }
 0x390   :  { %v368_v4 = vpop.xlane.xlu2 %367 }
 0x391   :  { %v372_v5 = vsub.f32 %v356_v63, %v368_v4 }
 0x393   :  { %v1252_v6 = vpop.eup %1251  ;;  %v379_v12 = vmul.f32 1.442695, %v372_v5 }
 0x394   :  { %v381_v13 = vsel %vm258_vm1, %v1252_v6, 0.0 }
 0x395   :  { %1253 = vpow2.f32 %v379_v12  ;;  %382 = vadd.xlane.f32.xlu2 %v381_v13 }
 0x39b   :  { %v1254_v14 = vpop.eup %1253 }
 0x39c   :  { %v390_v8 = vsel %vm258_vm1, %v1254_v14, 0.0 }
 0x39d   :  { %391 = vadd.xlane.f32.xlu0 %v390_v8 }
 0x3ba   :  { %v1471_v16 = vpop.f32.mrf.mxu1 }
 0x3bb   :  { %v610_v58 = vsel %vm37_vm0, %v1471_v16, 0.0 }
 0x3c2   :  { %v639_v17 = vpop.f32.mrf.mxu1 }
 0x3c3   :  { %675 = vxpose.xlu2.b32.start.end [1/1] (short) (narrow) %v639_v17, 8 }
 0x3ca   :  { %v642_v18 = vpop.f32.mrf.mxu1 }
 0x3cb   :  { %707 = vxpose.xlu0.b32.start.end [1/1] (short) (narrow) %v642_v18, 8 }
 0x3d2   :  { %v645_v19 = vpop.f32.mrf.mxu1 }
 0x3d3   :  { %739 = vxpose.xlu1.b32.start.end [1/1] (short) (narrow) %v645_v19, 8 }
 0x3da   :  { %v648_v23 = vpop.f32.mrf.mxu1 }
 0x3db   :  { %771 = vxpose.xlu2.b32.start.end [1/1] (short) (narrow) %v648_v23, 8 }
 0x3e2   :  { %v651_v39 = vpop.f32.mrf.mxu1 }
 0x3ea   :  { %v654_v40 = vpop.f32.mrf.mxu1 }
 0x3f2   :  { %v657_v41 = vpop.f32.mrf.mxu1 }
 0x3fa   :  { %v660_v46 = vpop.f32.mrf.mxu1 }
 0x408   :  { %v383_v22 = vpop.xlane.xlu2 %382 }
 0x409   :  { %1255 = vrcp.f32 %v383_v22 }
 0x40f   :  { %v1256_v24 = vpop.eup %1255 }
 0x410   :  { %v397_v25 = vmul.f32 %v1256_v24, %v383_v22  ;;  %v392_v26 = vpop.xlane.xlu0 %391 }
 0x411   :  { %1257 = vrcp.f32 %v392_v26 }
 0x412   :  { %v401_v27 = vsub.f32 2.0, %v397_v25 }
 0x414   :  { %v405_v31 = vmul.f32 %v1256_v24, %v401_v27 }
 0x416   :  { %v409_v32 = vmul.f32 %v1252_v6, %v405_v31 }
 0x417   :  { %v1258_v34 = vpop.eup %1257 }
 0x418   :  { %v400_v35 = vmul.f32 %v1258_v34, %v392_v26  ;;  %1196 = vmatmul.msk.f32.vlgmr.msrb.gmra.mxu2 %vm258_vm1, %v409_v32 }
 0x419   :  { %581 = vmatpush.msrb.mxu2 %v1477_v33 }
 0x41a   :  { %v404_v36 = vsub.f32 2.0, %v400_v35 }
 0x41c   :  { %v408_v37 = vmul.f32 %v1258_v34, %v404_v36 }
 0x41e   :  { %v412_v38 = vmul.f32 %v1254_v14, %v408_v37 }
 0x420   :  { %1202 = vmatmul.msk.f32.vlgmr.msra.gmra.mxu2 %vm258_vm1, %v412_v38 }
 0x421   :  { %1237 = vmatpush.xpose.msk.msra.mxu2 %vm37_vm0, %v1441_v9 }
 0x428   :  { %1205 = vmatmul.msk.f32.vlgmr.msrb.gmra.mxu2 %vm258_vm1, %v488_v15 }
 0x429   :  { %821 = vmatpush.msrb.mxu2 %v651_v39 }
 0x430   :  { %1217 = vmatmul.msk.f32.vlgmr.msra.gmra.mxu2 %vm37_vm0, %v1399_v28  ;;  %v1500_v28 = vld [vmem:[%s1561_s2 + $0x18] sm:$0xff]  ;;  %s1301_s2 = smov [#allocation2]  }
 0x431   :  { %867 = vmatpush.msra.mxu2 %v657_v41  ;;  %604 = vmatpush.msrb.mxu3 %v1500_v28  ;;  %s1164_s19 = sshll.u32 %s1301_s2, 4  ;;  %s1165_s19 = int_to_ptr.vmem [resolvable:$true] %s1164_s19 }
 0x438   :  { %1218 = vmatmul.msk.f32.gmra.mxu2 %vm37_vm0, %v1406_v29 }
 0x45c   :  { %v691_v43 = vpop.trf.xlu2 }
 0x45d   :  { %1221 = vmatmul.msk.f32.vlgmr.msrb.gmra.mxu2 %vm258_vm1, %v691_v43 }
 0x46f   :  { %v723_v49 = vpop.trf.xlu0 }
 0x474   :  { %v787_v51 = vpop.trf.xlu2 }
 0x477   :  { %v755_v44 = vpop.trf.xlu1 }
 0x478   :  { %1223 = vmatmul.msk.f32.vlgmr.msra.gmra.mxu2 %vm258_vm1, %v755_v44 }
 0x49b   :  { %v436_v29 = vpop.f32.mrf.mxu2 }
 0x49c   :  { %1203 = vmatmul.msk.f32.vlgmr.msra.gmra.mxu3 %vm258_vm1, %v436_v29 }
 0x49d   :  { %1238 = vmatpush.xpose.msk.msra.mxu3 %vm37_vm0, %v1441_v9 }
 0x4a3   :  { %v514_v45 = vpop.f32.mrf.mxu2 }
 0x4a4   :  { %1206 = vmatmul.msk.f32.vlgmr.msrb.gmra.mxu3 %vm258_vm1, %v514_v45 }
 0x4a5   :  { %844 = vmatpush.msrb.mxu3 %v654_v40 }
 0x4ab   :  { %v583_v47 = vpop.f32.mrf.mxu2 }
 0x4ac   :  { %1219 = vmatmul.msk.f32.vlgmr.msra.gmra.mxu3 %vm37_vm0, %v1413_v30  ;;  %v612_v61 = vsel %vm37_vm0, %v583_v47, 0.0 }
 0x4ad   :  { %890 = vmatpush.msra.mxu3 %v660_v46 }
 0x4b3   :  { %v663_v48 = vpop.f32.mrf.mxu2 }
 0x4b4   :  { %1220 = vmatmul.msk.f32.gmra.mxu3 %vm37_vm0, %v1461_v11  ;;  %1225 = vmatpush.xpose.msk.msrb.mxu2 %vm258_vm1, %v663_v48 }
 0x4bb   :  { %v666_v50 = vpop.f32.mrf.mxu2 }
 0x4bc   :  { %1222 = vmatmul.msk.f32.vlgmr.msrb.gmra.mxu3 %vm258_vm1, %v723_v49 }
 0x4bd   :  { %1227 = vmatpush.xpose.msk.msrb.mxu3 %vm258_vm1, %v666_v50 }
 0x4c4   :  { %1224 = vmatmul.msk.f32.vlgmr.msra.gmra.mxu3 %vm258_vm1, %v787_v51 }
 0x4e0   :  { %v823_v52 = vpop.f32.mrf.mxu2 }
 0x4e1   :  { %v895_v30 = vsel %vm1379_vm2, %v823_v52, -1e+30 }
 0x4e2   :  { %v899_v53 = vsel %vm258_vm1, %v895_v30, -inf }
 0x4e3   :  { %900 = vmax.xlane.f32.xlu0 %v899_v53 }
 0x4fb   :  { %v869_v54 = vpop.f32.mrf.mxu2 }
 0x4fc   :  { %v897_v55 = vsel %vm1379_vm2, %v869_v54, -1e+30 }
 0x4fd   :  { %v905_v56 = vsel %vm258_vm1, %v897_v55, -inf }
 0x4fe   :  { %906 = vmax.xlane.f32.xlu1 %v905_v56 }
 0x51f   :  { %v537_v57 = vpop.f32.mrf.mxu3 }
 0x520   :  { %v609_v59 = vsel %vm37_vm0, %v537_v57, 0.0 }
 0x521   :  { %v611_v60 = vadd.f32 %v610_v58, %v609_v59 }
 0x523   :  { %v613_v62 = vadd.f32 %v612_v61, %v611_v60 }
 0x527   :  { %v606_v63 = vpop.f32.mrf.mxu3 }
 0x528   :  { %v614_v7 = vsel %vm37_vm0, %v606_v63, 0.0 }
 0x529   :  { %v615_v9 = vadd.f32 %v614_v7, %v613_v62 }
 0x52b   :  { %616 = vst.msk [vmem:[#allocation2] sm:$0xff] %vm37_vm0, %v615_v9 }
 0x52f   :  { %v669_v10 = vpop.f32.mrf.mxu3 }
 0x530   :  { %1229 = vmatpush.xpose.msk.msra.mxu2 %vm258_vm1, %v669_v10 }
 0x537   :  { %v672_v11 = vpop.f32.mrf.mxu3 }
 0x538   :  { %1231 = vmatpush.xpose.msk.msra.mxu3 %vm258_vm1, %v672_v11 }
 0x53f   :  { %v846_v1 = vpop.f32.mrf.mxu3 }
 0x540   :  { %v896_v2 = vsel %vm1379_vm2, %v846_v1, -1e+30 }
 0x541   :  { %v902_v3 = vsel %vm258_vm1, %v896_v2, -inf }
 0x542   :  { %903 = vmax.xlane.f32.xlu2 %v902_v3 }
 0x547   :  { %v892_v4 = vpop.f32.mrf.mxu3 }
 0x548   :  { %v898_v5 = vsel %vm1379_vm2, %v892_v4, -1e+30 }
 0x549   :  { %v908_v6 = vsel %vm258_vm1, %v898_v5, -inf }
 0x54a   :  { %909 = vmax.xlane.f32.xlu0 %v908_v6 }
 0x556   :  { %v901_v12 = vpop.xlane.xlu0 %900 }
 0x557   :  { %v911_v13 = vsub.f32 %v895_v30, %v901_v12 }
 0x559   :  { %v915_v14 = vmul.f32 1.442695, %v911_v13 }
 0x55b   :  { %1259 = vpow2.f32 %v915_v14 }
 0x561   :  { %v1260_v8 = vpop.eup %1259 }
 0x562   :  { %v923_v15 = vsel %vm258_vm1, %v1260_v8, 0.0 }
 0x563   :  { %924 = vadd.xlane.f32.xlu2 %v923_v15 }
 0x571   :  { %v907_v16 = vpop.xlane.xlu1 %906 }
 0x572   :  { %v913_v17 = vsub.f32 %v897_v55, %v907_v16 }
 0x574   :  { %v919_v18 = vmul.f32 1.442695, %v913_v17 }
 0x576   :  { %1261 = vpow2.f32 %v919_v18 }
 0x57c   :  { %v1262_v19 = vpop.eup %1261 }
 0x57d   :  { %v929_v21 = vsel %vm258_vm1, %v1262_v19, 0.0 }
 0x57e   :  { %930 = vadd.xlane.f32.xlu2 %v929_v21 }
 0x5b5   :  { %v904_v20 = vpop.xlane.xlu2 %903 }
 0x5b6   :  { %v912_v22 = vsub.f32 %v896_v2, %v904_v20 }
 0x5b8   :  { %v917_v23 = vmul.f32 1.442695, %v912_v22 }
 0x5ba   :  { %1263 = vpow2.f32 %v917_v23 }
 0x5bd   :  { %v910_v24 = vpop.xlane.xlu0 %909 }
 0x5be   :  { %v914_v25 = vsub.f32 %v898_v5, %v910_v24 }
 0x5c0   :  { %v1264_v26 = vpop.eup %1263  ;;  %v921_v27 = vmul.f32 1.442695, %v914_v25 }
 0x5c1   :  { %v926_v31 = vsel %vm258_vm1, %v1264_v26, 0.0 }
 0x5c2   :  { %1265 = vpow2.f32 %v921_v27  ;;  %927 = vadd.xlane.f32.xlu0 %v926_v31 }
 0x5c8   :  { %v1266_v32 = vpop.eup %1265 }
 0x5c9   :  { %v932_v34 = vsel %vm258_vm1, %v1266_v32, 0.0 }
 0x5ca   :  { %933 = vadd.xlane.f32.xlu0 %v932_v34 }
 0x5d6   :  { %v925_v35 = vpop.xlane.xlu2 %924 }
 0x5d7   :  { %1267 = vrcp.f32 %v925_v35 }
 0x5dd   :  { %v1268_v36 = vpop.eup %1267 }
 0x5de   :  { %v939_v37 = vmul.f32 %v1268_v36, %v925_v35 }
 0x5e0   :  { %v943_v38 = vsub.f32 2.0, %v939_v37 }
 0x5e2   :  { %v947_v39 = vmul.f32 %v1268_v36, %v943_v38 }
 0x5e4   :  { %v951_v40 = vmul.f32 %v1260_v8, %v947_v39 }
 0x5e6   :  { %1226 = vmatmul.msk.f32.vlgmr.msrb.gmra.mxu2 %vm258_vm1, %v951_v40 }
 0x5e7   :  { %1077 = vmatpush.msrb.mxu2 %v1492_v42 }
 0x5f1   :  { %v931_v41 = vpop.xlane.xlu2 %930 }
 0x5f2   :  { %1269 = vrcp.f32 %v931_v41 }
 0x5f8   :  { %v1270_v43 = vpop.eup %1269 }
 0x5f9   :  { %v941_v44 = vmul.f32 %v1270_v43, %v931_v41 }
 0x5fb   :  { %v945_v29 = vsub.f32 2.0, %v941_v44 }
 0x5fd   :  { %v949_v45 = vmul.f32 %v1270_v43, %v945_v29 }
 0x5ff   :  { %v953_v46 = vmul.f32 %v1262_v19, %v949_v45 }
 0x601   :  { %1230 = vmatmul.msk.f32.vlgmr.msra.gmra.mxu2 %vm258_vm1, %v953_v46 }
 0x602   :  { %1123 = vmatpush.msra.mxu2 %v1477_v33 }
 0x635   :  { %v928_v47 = vpop.xlane.xlu0 %927 }
 0x636   :  { %1271 = vrcp.f32 %v928_v47 }
 0x63c   :  { %v1272_v48 = vpop.eup %1271 }
 0x63d   :  { %v940_v49 = vmul.f32 %v1272_v48, %v928_v47  ;;  %v934_v50 = vpop.xlane.xlu0 %933 }
 0x63e   :  { %1273 = vrcp.f32 %v934_v50 }
 0x63f   :  { %v944_v51 = vsub.f32 2.0, %v940_v49 }
 0x641   :  { %v948_v52 = vmul.f32 %v1272_v48, %v944_v51 }
 0x643   :  { %v952_v42 = vmul.f32 %v1264_v26, %v948_v52 }
 0x644   :  { %v1274_v30 = vpop.eup %1273 }
 0x645   :  { %v942_v53 = vmul.f32 %v1274_v30, %v934_v50  ;;  %1228 = vmatmul.msk.f32.vlgmr.msrb.gmra.mxu3 %vm258_vm1, %v952_v42 }
 0x646   :  { %1100 = vmatpush.msrb.mxu3 %v1434_v0 }
 0x647   :  { %v946_v54 = vsub.f32 2.0, %v942_v53 }
 0x649   :  { %v950_v55 = vmul.f32 %v1274_v30, %v946_v54 }
 0x64b   :  { %v954_v56 = vmul.f32 %v1266_v32, %v950_v55 }
 0x64d   :  { %1232 = vmatmul.msk.f32.vlgmr.msra.gmra.mxu3 %vm258_vm1, %v954_v56 }
 0x64e   :  { %1146 = vmatpush.msra.mxu3 %v1500_v28 }
 0x669   :  { %v978_v33 = vpop.f32.mrf.mxu2 }
 0x66a   :  { %1233 = vmatmul.msk.f32.vlgmr.msrb.gmra.mxu2 %vm258_vm1, %v978_v33 }
 0x684   :  { %v1030_v57 = vpop.f32.mrf.mxu2 }
 0x685   :  { %1235 = vmatmul.msk.f32.vlgmr.msra.gmra.mxu2 %vm258_vm1, %v1030_v57 }
 0x6c8   :  { %v1004_v58 = vpop.f32.mrf.mxu3 }
 0x6c9   :  { %1234 = vmatmul.msk.f32.vlgmr.msrb.gmra.mxu3 %vm258_vm1, %v1004_v58 }
 0x6d0   :  { %v1056_v59 = vpop.f32.mrf.mxu3 }
 0x6d1   :  { %1236 = vmatmul.msk.f32.vlgmr.msra.gmra.mxu3 %vm258_vm1, %v1056_v59 }
 0x6ed   :  { %v1079_v0 = vpop.f32.mrf.mxu2 }
 0x6ee   :  { %v1151_v62 = vsel %vm37_vm0, %v1079_v0, 0.0 }
 0x708   :  { %v1125_v63 = vpop.f32.mrf.mxu2 }
 0x709   :  { %v1154_v7 = vsel %vm37_vm0, %v1125_v63, 0.0 }
 0x74c   :  { %v1102_v60 = vpop.f32.mrf.mxu3 }
 0x74d   :  { %v1152_v61 = vsel %vm37_vm0, %v1102_v60, 0.0 }
 0x74e   :  { %v1153_v28 = vadd.f32 %v1152_v61, %v1151_v62 }
 0x750   :  { %v1155_v10 = vadd.f32 %v1154_v7, %v1153_v28 }
 0x754   :  { %v1148_v9 = vpop.f32.mrf.mxu3 }
 0x755   :  { %v1156_v11 = vsel %vm37_vm0, %v1148_v9, 0.0 }
 0x756   :  { %v1157_v1 = vadd.f32 %v1156_v11, %v1155_v10 }
 0x758   :  { %1159 = vst.msk [vmem:[#allocation2 + $0x8] sm:$0xff] %vm37_vm0, %v1157_v1 }
 0x759   :  { %1172 = dma.vmem_to_hbm [thread:$0]  %s1165_s19, 256, %s1167_s22, [#allocation3], %s1302_s23, %s1302_s23, %s1303_s24  }
 0x75a   :  { %1299 = dma.done.wait [#allocation3], 256  }
 0x75b   :  { %1300 = vsyncadd [#allocation3], 4294967040 }
 0x75c   :  { %1177 = vsyncpa [#allocation3], 1 }

</bundles_post_ra>
